<compile_context>
chip_gen: v6e
topology: v6e:2x2x1
jax: 0.10.0
libtpu: 0.0.40
codegen_flags: <defaults>
</compile_context>

<pallas_src>
import functools

import jax
import jax.numpy as jnp
from jax.experimental import pallas as pl
from jax.experimental.pallas import tpu as pltpu


def _round_up(x: int, m: int) -> int:
    return ((x + m - 1) // m) * m


def _ffn_kernel(x_ref, w1_ref, b1_ref, w2_ref, b2_ref, o_ref):
    # x_ref : (TM, E)   w1_ref : (E, H)   b1_ref : (1, H)
    # w2_ref: (H, E)    b2_ref : (1, E)   o_ref  : (TM, E)
    x = x_ref[...]

    # First linear: (TM, E) @ (E, H) -> f32 (TM, H)   [MXU, f32 accumulation]
    h = jnp.dot(x, w1_ref[...], preferred_element_type=jnp.float32)
    h = h + b1_ref[...].astype(jnp.float32)

    # GELU (tanh approximation), exactly as in the PyTorch module   [VPU + EUP]
    c = jnp.float32((2.0 / jnp.pi) ** 0.5)
    h = 0.5 * h * (1.0 + jnp.tanh(c * (h + 0.044715 * (h * h * h))))

    # Second linear: (TM, H) @ (H, E) -> f32 (TM, E)   [MXU, f32 accumulation]
    # Cast the activation to the weight dtype so bf16 weights hit the bf16
    # MXU fast path; for f32 weights this is a no-op.
    y = jnp.dot(h.astype(w2_ref.dtype), w2_ref[...],
                preferred_element_type=jnp.float32)
    y = y + b2_ref[...].astype(jnp.float32)

    o_ref[...] = y.astype(o_ref.dtype)


def feed_forward(x, w1, b1, w2, b2, *, tm=256, vmem_limit_bytes=None):
    """FeedForward forward pass.

    x : (B, S, E)
    w1: (E, 4E)   b1: (4E,)     (stored input-major, i.e. torch W1.T)
    w2: (4E, E)   b2: (E,)      (stored input-major, i.e. torch W2.T)

    tm: row tile (tune per chip: ~128-256 on v7x (64 MiB VMEM),
        512-1024 on v6e with a raised vmem_limit_bytes).
    """
    B, S, E = x.shape
    H = w1.shape[1]
    M = B * S

    # Lane-dense padding: E and H up to multiples of 128.
    E_pad = _round_up(E, 128)
    H_pad = _round_up(H, 128)

    # Row tile: clamp to the (sublane-rounded) problem size, then pad M.
    tm = max(8, min(tm, _round_up(M, 8)))
    M_pad = _round_up(M, tm)
    grid = (M_pad // tm,)

    x2d = jnp.pad(x.reshape(M, E), ((0, M_pad - M), (0, E_pad - E)))
    w1p = jnp.pad(w1, ((0, E_pad - E), (0, H_pad - H)))
    b1p = jnp.pad(b1, (0, H_pad - H)).reshape(1, H_pad)
    w2p = jnp.pad(w2, ((0, H_pad - H), (0, E_pad - E)))
    b2p = jnp.pad(b2, (0, E_pad - E)).reshape(1, E_pad)

    # TODO(synk): for GPT-2-sized E/H on v5e/v6e, pass vmem_limit_bytes
    # (e.g. 64<<20 on v6e) or bf16 weights so the resident weights +
    # double-buffered row tiles fit the scoped VMEM limit.
    compiler_params = pltpu.CompilerParams(
        dimension_semantics=("parallel",),
        vmem_limit_bytes=vmem_limit_bytes,
    )

    out = pl.pallas_call(
        _ffn_kernel,
        out_shape=jax.ShapeDtypeStruct((M_pad, E_pad), x.dtype),
        grid_spec=pltpu.PrefetchScalarGridSpec(
            num_scalar_prefetch=0,
            grid=grid,
            in_specs=[
                # x: streams through VMEM, one (tm, E_pad) tile per grid step.
                pl.BlockSpec((tm, E_pad), lambda i: (i, 0)),
                # Weights/biases: constant block index -> VMEM-resident.
                pl.BlockSpec((E_pad, H_pad), lambda i: (0, 0)),
                pl.BlockSpec((1, H_pad), lambda i: (0, 0)),
                pl.BlockSpec((H_pad, E_pad), lambda i: (0, 0)),
                pl.BlockSpec((1, E_pad), lambda i: (0, 0)),
            ],
            out_specs=pl.BlockSpec((tm, E_pad), lambda i: (i, 0)),
        ),
        compiler_params=compiler_params,
    )(x2d, w1p, b1p, w2p, b2p)

    return out[:M, :E].reshape(B, S, E)


def _reference(x, w1, b1, w2, b2):
    h = jnp.einsum("bse,eh->bsh", x.astype(jnp.float32),
                   w1.astype(jnp.float32)) + b1.astype(jnp.float32)
    c = (2.0 / jnp.pi) ** 0.5
    h = 0.5 * h * (1.0 + jnp.tanh(c * (h + 0.044715 * h ** 3)))
    return (jnp.einsum("bsh,he->bse", h, w2.astype(jnp.float32))
            + b2.astype(jnp.float32))


if __name__ == "__main__":
    # cfg['emb_dim'] = 32; hidden = 4 * emb_dim = 128
    B, S, E = 2, 8, 32
    H = 4 * E

    key = jax.random.PRNGKey(0)
    kx, kw1, kb1, kw2, kb2 = jax.random.split(key, 5)

    x = jax.random.normal(kx, (B, S, E), dtype=jnp.float32)
    w1 = jax.random.normal(kw1, (E, H), dtype=jnp.float32) * 0.02
    b1 = jax.random.normal(kb1, (H,), dtype=jnp.float32) * 0.02
    w2 = jax.random.normal(kw2, (H, E), dtype=jnp.float32) * 0.02
    b2 = jax.random.normal(kb2, (E,), dtype=jnp.float32) * 0.02

    ffn = jax.jit(functools.partial(feed_forward, tm=256))

    # f32 path: must match the reference tightly.
    y = ffn(x, w1, b1, w2, b2)
    jax.block_until_ready(y)
    y_ref = _reference(x, w1, b1, w2, b2)
    assert y.shape == (B, S, E)
    assert jnp.allclose(y, y_ref, atol=1e-5, rtol=1e-5), "f32 mismatch"

    # bf16 path (MXU fast path: bf16 inputs/weights, f32 accumulation,
    # f32 bias add + GELU inside the kernel). Looser tolerance vs f32 ref.
    y_bf16 = ffn(x.astype(jnp.bfloat16),
                 w1.astype(jnp.bfloat16), b1,
                 w2.astype(jnp.bfloat16), b2)
    jax.block_until_ready(y_bf16)
    assert y_bf16.dtype == jnp.bfloat16
    assert jnp.allclose(y_bf16.astype(jnp.float32), y_ref,
                        atol=5e-3, rtol=5e-2), "bf16 mismatch"

    print("KERNEL_OK")
</pallas_src>

<mosaic_0001>
module attributes {stable_mosaic.version = 11 : i64} {
  func.func @_ffn_kernel(%arg0: i32, %arg1: memref<16x128xf32, #tpu.memory_space<vmem>>, %arg2: memref<128x128xf32, #tpu.memory_space<vmem>>, %arg3: memref<1x128xf32, #tpu.memory_space<vmem>>, %arg4: memref<128x128xf32, #tpu.memory_space<vmem>>, %arg5: memref<1x128xf32, #tpu.memory_space<vmem>>, %arg6: memref<16x128xf32, #tpu.memory_space<vmem>>) attributes {dimension_semantics = [#tpu.dimension_semantics<parallel>], iteration_bounds = array<i64: 1>, scalar_prefetch = 0 : i64, scratch_operands = 0 : i64, tpu.core_type = #tpu.core_type<tc>, window_params = [{transform_indices = @transform_0, window_bounds = array<i64: 16, 128>}, {pipeline_mode = #tpu.pipeline_mode<synchronous>, transform_indices = @transform_1, window_bounds = array<i64: 128, 128>}, {pipeline_mode = #tpu.pipeline_mode<synchronous>, transform_indices = @transform_2, window_bounds = array<i64: 1, 128>}, {pipeline_mode = #tpu.pipeline_mode<synchronous>, transform_indices = @transform_3, window_bounds = array<i64: 128, 128>}, {pipeline_mode = #tpu.pipeline_mode<synchronous>, transform_indices = @transform_4, window_bounds = array<i64: 1, 128>}, {transform_indices = @transform_5, window_bounds = array<i64: 16, 128>}]} {
    %c0 = arith.constant 0 : index
    %c0_0 = arith.constant 0 : index
    %0 = vector.load %arg1[%c0, %c0_0] : memref<16x128xf32, #tpu.memory_space<vmem>>, vector<16x128xf32>
    %c0_1 = arith.constant 0 : index
    %c0_2 = arith.constant 0 : index
    %1 = vector.load %arg2[%c0_1, %c0_2] : memref<128x128xf32, #tpu.memory_space<vmem>>, vector<128x128xf32>
    %cst = arith.constant dense<0.000000e+00> : vector<16x128xf32>
    %2 = tpu.matmul %0, %1, %cst {dimension_numbers = #tpu.dot_dimension_numbers<[1], [0], [0], [1], [0, 0, 1, 1], [], []>} : vector<16x128xf32>, vector<128x128xf32>, vector<16x128xf32> -> vector<16x128xf32>
    %c0_3 = arith.constant 0 : index
    %c0_4 = arith.constant 0 : index
    %3 = vector.load %arg3[%c0_3, %c0_4] : memref<1x128xf32, #tpu.memory_space<vmem>>, vector<1x128xf32>
    %4 = vector.broadcast %3 : vector<1x128xf32> to vector<16x128xf32>
    %5 = arith.addf %2, %4 : vector<16x128xf32>
    %cst_5 = arith.constant 5.000000e-01 : f32
    %6 = vector.broadcast %cst_5 : f32 to vector<16x128xf32>
    %7 = arith.mulf %6, %5 : vector<16x128xf32>
    %8 = arith.mulf %5, %5 : vector<16x128xf32>
    %9 = arith.mulf %8, %5 : vector<16x128xf32>
    %cst_6 = arith.constant 4.471500e-02 : f32
    %10 = vector.broadcast %cst_6 : f32 to vector<16x128xf32>
    %11 = arith.mulf %10, %9 : vector<16x128xf32>
    %12 = arith.addf %5, %11 : vector<16x128xf32>
    %cst_7 = arith.constant 0.797884583 : f32
    %13 = vector.broadcast %cst_7 : f32 to vector<16x128xf32>
    %14 = arith.mulf %13, %12 : vector<16x128xf32>
    %15 = math.tanh %14 : vector<16x128xf32>
    %cst_8 = arith.constant 1.000000e+00 : f32
    %16 = vector.broadcast %cst_8 : f32 to vector<16x128xf32>
    %17 = arith.addf %16, %15 : vector<16x128xf32>
    %18 = arith.mulf %7, %17 : vector<16x128xf32>
    %c0_9 = arith.constant 0 : index
    %c0_10 = arith.constant 0 : index
    %19 = vector.load %arg4[%c0_9, %c0_10] : memref<128x128xf32, #tpu.memory_space<vmem>>, vector<128x128xf32>
    %cst_11 = arith.constant dense<0.000000e+00> : vector<16x128xf32>
    %20 = tpu.matmul %18, %19, %cst_11 {dimension_numbers = #tpu.dot_dimension_numbers<[1], [0], [0], [1], [0, 0, 1, 1], [], []>} : vector<16x128xf32>, vector<128x128xf32>, vector<16x128xf32> -> vector<16x128xf32>
    %c0_12 = arith.constant 0 : index
    %c0_13 = arith.constant 0 : index
    %21 = vector.load %arg5[%c0_12, %c0_13] : memref<1x128xf32, #tpu.memory_space<vmem>>, vector<1x128xf32>
    %22 = vector.broadcast %21 : vector<1x128xf32> to vector<16x128xf32>
    %23 = arith.addf %20, %22 : vector<16x128xf32>
    %c0_14 = arith.constant 0 : index
    %c0_15 = arith.constant 0 : index
    %24 = vector.load %arg6[%c0_14, %c0_15] : memref<16x128xf32, #tpu.memory_space<vmem>>, vector<16x128xf32>
    tpu.vector_store %arg6[%c0_14, %c0_15], %23 {strides = array<i32>} : memref<16x128xf32, #tpu.memory_space<vmem>>, vector<16x128xf32>,
    return
  }
  func.func @transform_0(%arg0: i32) -> (i32, i32) {
    %c0_i32 = arith.constant 0 : i32
    %c0_i32_0 = arith.constant 0 : i32
    return %arg0, %c0_i32 : i32, i32
  }
  func.func @transform_1(%arg0: i32) -> (i32, i32) {
    %c0_i32 = arith.constant 0 : i32
    %c0_i32_0 = arith.constant 0 : i32
    %c0_i32_1 = arith.constant 0 : i32
    return %c0_i32, %c0_i32_0 : i32, i32
  }
  func.func @transform_2(%arg0: i32) -> (i32, i32) {
    %c0_i32 = arith.constant 0 : i32
    %c0_i32_0 = arith.constant 0 : i32
    %c0_i32_1 = arith.constant 0 : i32
    return %c0_i32, %c0_i32_0 : i32, i32
  }
  func.func @transform_3(%arg0: i32) -> (i32, i32) {
    %c0_i32 = arith.constant 0 : i32
    %c0_i32_0 = arith.constant 0 : i32
    %c0_i32_1 = arith.constant 0 : i32
    return %c0_i32, %c0_i32_0 : i32, i32
  }
  func.func @transform_4(%arg0: i32) -> (i32, i32) {
    %c0_i32 = arith.constant 0 : i32
    %c0_i32_0 = arith.constant 0 : i32
    %c0_i32_1 = arith.constant 0 : i32
    return %c0_i32, %c0_i32_0 : i32, i32
  }
  func.func @transform_5(%arg0: i32) -> (i32, i32) {
    %c0_i32 = arith.constant 0 : i32
    %c0_i32_0 = arith.constant 0 : i32
    return %arg0, %c0_i32 : i32, i32
  }
}

</mosaic_0001>

<bundles_post_ra>
// kernel: feed_forward.1
= control target key start
LH: loop header
LB: loop body
LE: loop exit
PB: predicated region body
PF: predicated region fallthrough
CT: control target
= control target key end

     0   :  { %s498_s1 = inlined_call_operand.vmem [shape: f32[128,128], index: 1, kind: input, shape index: {}]   ;;  %s499_s0 = inlined_call_operand.vmem [shape: f32[16,128], index: 0, kind: input, shape index: {}]   ;;  %s500_s3 = inlined_call_operand.vmem [shape: f32[128,128], index: 3, kind: input, shape index: {}]   ;;  %s501_s2 = inlined_call_operand.vmem [shape: f32[1,128], index: 2, kind: input, shape index: {}]   ;;  %s502_s4 = inlined_call_operand.vmem [shape: f32[1,128], index: 4, kind: input, shape index: {}]   ;;  %s503_s5 = inlined_call_operand.vmem [shape: f32[16,128], index: 5, kind: output, shape index: {}]  }
   0x1   :  { %v37_v0 = vld [vmem:[%s498_s1 + $0x78] sm:$0xff]  ;;  %v36_v1 = vld [vmem:[%s498_s1 + $0x70] sm:$0xff]  ;;  %v35_v2 = vld [vmem:[%s498_s1 + $0x68] sm:$0xff] }
   0x2   :  { %280 = vmatprep.subr.mxu0 %v37_v0  ;;  %v34_v3 = vld [vmem:[%s498_s1 + $0x60] sm:$0xff]  ;;  %v33_v5 = vld [vmem:[%s498_s1 + $0x58] sm:$0xff]  ;;  %v32_v6 = vld [vmem:[%s498_s1 + $0x50] sm:$0xff] }
   0x3   :  { %281 = vmatpush3.msra.mxu0 %v37_v0  ;;  %v20_v4 = vld [vmem:[%s499_s0] sm:$0xff]  ;;  %v31_v7 = vld [vmem:[%s498_s1 + $0x48] sm:$0xff]  ;;  %v29_v9 = vld [vmem:[%s498_s1 + $0x38] sm:$0xff] }
   0x4   :  { %282 = vmatprep.subr.mxu0 %v36_v1  ;;  %312 = vmatprep.mubr.f32.mxu0 %v20_v4  ;;  %v30_v8 = vld [vmem:[%s498_s1 + $0x40] sm:$0xff]  ;;  %v28_v10 = vld [vmem:[%s498_s1 + $0x30] sm:$0xff]  ;;  %v27_v11 = vld [vmem:[%s498_s1 + $0x28] sm:$0xff] }
   0x5   :  { %283 = vmatpush3.msra.mxu0 %v36_v1  ;;  %v26_v12 = vld [vmem:[%s498_s1 + $0x20] sm:$0xff]  ;;  %v25_v13 = vld [vmem:[%s498_s1 + $0x18] sm:$0xff]  ;;  %v24_v14 = vld [vmem:[%s498_s1 + $0x10] sm:$0xff] }
   0x6   :  { %284 = vmatprep.subr.mxu0 %v35_v2  ;;  %v23_v15 = vld [vmem:[%s498_s1 + $0x8] sm:$0xff]  ;;  %v22_v16 = vld [vmem:[%s498_s1] sm:$0xff]  ;;  %v153_v18 = vld [vmem:[%s500_s3 + $0x78] sm:$0xff] }
   0x7   :  { %285 = vmatpush3.msra.mxu0 %v35_v2  ;;  %v21_v17 = vld [vmem:[%s499_s0 + $0x8] sm:$0xff]  ;;  %315 = vmatprep.subr.mxu1 %v153_v18  ;;  %v152_v19 = vld [vmem:[%s500_s3 + $0x70] sm:$0xff]  ;;  %v150_v21 = vld [vmem:[%s500_s3 + $0x60] sm:$0xff] }
   0x8   :  { %286 = vmatprep.subr.mxu0 %v34_v3  ;;  %316 = vmatpush3.msra.mxu1 %v153_v18  ;;  %v151_v20 = vld [vmem:[%s500_s3 + $0x68] sm:$0xff]  ;;  %v149_v22 = vld [vmem:[%s500_s3 + $0x58] sm:$0xff]  ;;  %v148_v23 = vld [vmem:[%s500_s3 + $0x50] sm:$0xff] }
   0x9   :  { %287 = vmatpush3.msra.mxu0 %v34_v3  ;;  %317 = vmatprep.subr.mxu1 %v152_v19  ;;  %v147_v24 = vld [vmem:[%s500_s3 + $0x48] sm:$0xff]  ;;  %v146_v25 = vld [vmem:[%s500_s3 + $0x40] sm:$0xff]  ;;  %v145_v26 = vld [vmem:[%s500_s3 + $0x38] sm:$0xff] }
   0xa   :  { %288 = vmatprep.subr.mxu0 %v33_v5  ;;  %318 = vmatpush3.msra.mxu1 %v152_v19  ;;  %v144_v27 = vld [vmem:[%s500_s3 + $0x30] sm:$0xff]  ;;  %v143_v28 = vld [vmem:[%s500_s3 + $0x28] sm:$0xff]  ;;  %v142_v29 = vld [vmem:[%s500_s3 + $0x20] sm:$0xff] }
   0xb   :  { %289 = vmatpush3.msra.mxu0 %v33_v5  ;;  %319 = vmatprep.subr.mxu1 %v151_v20  ;;  %v141_v30 = vld [vmem:[%s500_s3 + $0x18] sm:$0xff]  ;;  %v140_v31 = vld [vmem:[%s500_s3 + $0x10] sm:$0xff]  ;;  %v139_v32 = vld [vmem:[%s500_s3 + $0x8] sm:$0xff] }
   0xc   :  { %290 = vmatprep.subr.mxu0 %v32_v6  ;;  %320 = vmatpush3.msra.mxu1 %v151_v20  ;;  %v138_v33 = vld [vmem:[%s500_s3] sm:$0xff] }
   0xd   :  { %291 = vmatpush3.msra.mxu0 %v32_v6  ;;  %321 = vmatprep.subr.mxu1 %v150_v21  ;;  %v242_v34 = vld [vmem:[%s501_s2] ss:$0 sm:$0xff] }
   0xe   :  { %292 = vmatprep.subr.mxu0 %v31_v7  ;;  %322 = vmatpush3.msra.mxu1 %v150_v21  ;;  %v243_v57 = vld [vmem:[%s502_s4] ss:$0 sm:$0xff] }
   0xf   :  { %293 = vmatpush3.msra.mxu0 %v31_v7  ;;  %323 = vmatprep.subr.mxu1 %v149_v22 }
  0x10   :  { %294 = vmatprep.subr.mxu0 %v30_v8  ;;  %324 = vmatpush3.msra.mxu1 %v149_v22 }
  0x11   :  { %295 = vmatpush3.msra.mxu0 %v30_v8  ;;  %325 = vmatprep.subr.mxu1 %v148_v23 }
  0x12   :  { %296 = vmatprep.subr.mxu0 %v29_v9  ;;  %326 = vmatpush3.msra.mxu1 %v148_v23 }
  0x13   :  { %297 = vmatpush3.msra.mxu0 %v29_v9  ;;  %327 = vmatprep.subr.mxu1 %v147_v24 }
  0x14   :  { %298 = vmatprep.subr.mxu0 %v28_v10  ;;  %328 = vmatpush3.msra.mxu1 %v147_v24 }
  0x15   :  { %299 = vmatpush3.msra.mxu0 %v28_v10  ;;  %329 = vmatprep.subr.mxu1 %v146_v25 }
  0x16   :  { %300 = vmatprep.subr.mxu0 %v27_v11  ;;  %330 = vmatpush3.msra.mxu1 %v146_v25 }
  0x17   :  { %301 = vmatpush3.msra.mxu0 %v27_v11  ;;  %331 = vmatprep.subr.mxu1 %v145_v26 }
  0x18   :  { %302 = vmatprep.subr.mxu0 %v26_v12  ;;  %332 = vmatpush3.msra.mxu1 %v145_v26 }
  0x19   :  { %303 = vmatpush3.msra.mxu0 %v26_v12  ;;  %333 = vmatprep.subr.mxu1 %v144_v27 }
  0x1a   :  { %304 = vmatprep.subr.mxu0 %v25_v13  ;;  %334 = vmatpush3.msra.mxu1 %v144_v27 }
  0x1b   :  { %305 = vmatpush3.msra.mxu0 %v25_v13  ;;  %335 = vmatprep.subr.mxu1 %v143_v28 }
  0x1c   :  { %306 = vmatprep.subr.mxu0 %v24_v14  ;;  %336 = vmatpush3.msra.mxu1 %v143_v28 }
  0x1d   :  { %307 = vmatpush3.msra.mxu0 %v24_v14  ;;  %337 = vmatprep.subr.mxu1 %v142_v29 }
  0x1e   :  { %308 = vmatprep.subr.mxu0 %v23_v15  ;;  %338 = vmatpush3.msra.mxu1 %v142_v29 }
  0x1f   :  { %309 = vmatpush3.msra.mxu0 %v23_v15  ;;  %339 = vmatprep.subr.mxu1 %v141_v30 }
  0x20   :  { %310 = vmatprep.subr.mxu0 %v22_v16  ;;  %340 = vmatpush3.msra.mxu1 %v141_v30 }
  0x21   :  { %311 = vmatpush3.msra.mxu0 %v22_v16  ;;  %341 = vmatprep.subr.mxu1 %v140_v31 }
  0x22   :  { %313 = vmatmul.mubr.f32.vlgmr.msra.gmra.mxu0 %v21_v17  ;;  %342 = vmatpush3.msra.mxu1 %v140_v31 }
  0x23   :  { %343 = vmatprep.subr.mxu1 %v139_v32 }
  0x24   :  { %344 = vmatpush3.msra.mxu1 %v139_v32 }
  0x25   :  { %345 = vmatprep.subr.mxu1 %v138_v33 }
  0x26   :  { %346 = vmatpush3.msra.mxu1 %v138_v33 }
  0xe2   :  { %v314_v35 = vpop.f32.mrf.mxu0 }
  0xe3   :  { %v117_v36 = vadd.f32 %v314_v35, %v242_v34 }
  0xe4   :  { %v111_v37 = vpop.f32.mrf.mxu0 }
  0xe5   :  { %v123_v38 = vmul.f32 %v117_v36, %v117_v36  ;;  %v112_v39 = vadd.f32 %v242_v34, %v111_v37  ;;  %v121_v54 = vmul.f32 0.5, %v117_v36 }
  0xe7   :  { %v125_v40 = vmul.f32 %v123_v38, %v117_v36  ;;  %v122_v41 = vmul.f32 %v112_v39, %v112_v39  ;;  %v120_v52 = vmul.f32 0.5, %v112_v39 }
  0xe9   :  { %v127_v42 = vmul.f32 0.044715, %v125_v40  ;;  %v124_v43 = vmul.f32 %v122_v41, %v112_v39 }
  0xeb   :  { %v129_v44 = vadd.f32 %v127_v42, %v117_v36  ;;  %v126_v45 = vmul.f32 0.044715, %v124_v43 }
  0xed   :  { %v131_v46 = vmul.f32 0.7978846, %v129_v44  ;;  %v128_v47 = vadd.f32 %v126_v45, %v112_v39 }
  0xef   :  { %v130_v48 = vmul.f32 0.7978846, %v128_v47  ;;  %350 = vtanh.f32 %v131_v46 }
  0xf1   :  { %352 = vtanh.f32 %v130_v48 }
  0xfc   :  { %v351_v49 = vpop.eup %350 }
  0xfd   :  { %v135_v51 = vadd.f32 1.0, %v351_v49 }
  0xfe   :  { %v353_v50 = vpop.eup %352 }
  0xff   :  { %v134_v53 = vadd.f32 1.0, %v353_v50  ;;  %v137_v56 = vmul.f32 %v135_v51, %v121_v54 }
 0x101   :  { %v136_v55 = vmul.f32 %v134_v53, %v120_v52 }
 0x103   :  { %347 = vmatprep.mubr.f32.mxu1 %v136_v55 }
 0x104   :  { %348 = vmatmul.mubr.f32.vlgmr.msra.gmra.mxu1 %v137_v56 }
 0x1c4   :  { %v349_v58 = vpop.f32.mrf.mxu1 }
 0x1c5   :  { %v233_v59 = vadd.f32 %v349_v58, %v243_v57 }
 0x1c6   :  { %v227_v60 = vpop.f32.mrf.mxu1 }
 0x1c7   :  { %237 = vst [vmem:[%s503_s5 + $0x8] sm:$0xff] %v233_v59  ;;  %v228_v61 = vadd.f32 %v243_v57, %v227_v60 }
 0x1c9   :  { %236 = vst [vmem:[%s503_s5] sm:$0xff] %v228_v61 }

</bundles_post_ra>
